<compile_context>
chip_gen: v6e
topology: v6e:2x2x1
jax: 0.10.0
libtpu: 0.0.40
codegen_flags: <defaults>
</compile_context>

<pallas_src>
import jax
import jax.numpy as jnp
from jax.experimental import pallas as pl
from jax.experimental.pallas import tpu as pltpu

_ALPHA = 3.230769230769231
_BETA = _ALPHA + 3.0
_INV_BETA = 1.0 / _BETA

_LANES = 128
# 16384 rows x 128 lanes x 4 B = 8 MiB per f32 block; in+out, double-buffered
# -> worst case ~32 MiB VMEM, under the 48 MiB scoped limit and under v7x's
# 64 MiB per-TC capacity with headroom (plenty of room on v5e/v6e's 128 MiB).
_MAX_TILE_ROWS = 16384
# Above ~1 MiB of data, split into >= 2 grid steps so DMA/compute overlap and
# the v7x megacore split ("parallel" grid axis) actually has work to share.
_SPLIT_ROWS = 2048


def _fastswish_kernel(x_ref, o_ref):
    # fp16 -> fp32 cast fused into the kernel (no separate XLA pass).
    x = x_ref[...].astype(jnp.float32)
    # Middle branch: x * (x + alpha) / beta with the constant divide folded
    # into a multiply (kernel is DMA-bound; keep VALU work minimal).
    y = x * (x + _ALPHA) * _INV_BETA
    # y[x > 3] = x
    y = jnp.where(x > 3.0, x, y)
    # y[x < -3] = -1 / x**2.  Approx reciprocal goes to the EUP slot (free on a
    # DMA-bound kernel); one Newton step restores ~full f32 accuracy.
    d = x * x
    r = pl.reciprocal(d, approx=True)
    r = r * (2.0 - d * r)
    # Note: r is computed on every lane; lanes with x == 0 produce inf/nan here
    # but are never selected (x == 0 fails x < -3), so the forward value is
    # unaffected (select, not arithmetic).
    y = jnp.where(x < -3.0, -r, y)
    o_ref[...] = y.astype(o_ref.dtype)


def _fastswish_jnp(x):
    """Plain-JAX reference / tail path (matches the PyTorch forward)."""
    if x.dtype == jnp.float16:
        x = x.astype(jnp.float32)
    y = x * (x + _ALPHA) / _BETA
    y = jnp.where(x > 3.0, x, y)
    y = jnp.where(x < -3.0, -1.0 / (x * x), y)
    return y


def _pick_tile_rows(rows: int) -> int:
    if rows <= _SPLIT_ROWS:
        # Small input: one step; per-step overhead is negligible at this size
        # and block rows == full dim is always a legal block shape.
        return rows
    # Force >= 2 grid steps (block rows kept a multiple of 8 for the sublane
    # constraint), capped at the 8 MiB block size. Large inputs naturally get
    # many steps of the maximum block size.
    half = pl.cdiv(rows, 2)
    half = ((half + 7) // 8) * 8
    return min(_MAX_TILE_ROWS, half)


def fastswish_custom_grad(x: jax.Array) -> jax.Array:
    """Forward of FastSwishCustomGrad. fp16 inputs produce fp32 outputs
    (matching the PyTorch module); the promotion happens inside the kernel."""
    # TODO(synk): only the forward pass is implemented here; the module's
    # custom backward (fastswish_grad.backward) is not wired up as a JAX VJP.
    out_dtype = jnp.float32 if x.dtype == jnp.float16 else x.dtype
    orig_shape = x.shape
    flat = x.reshape(-1)
    n = flat.shape[0]
    n_main = (n // _LANES) * _LANES

    if n_main == 0:
        # Fewer than 128 elements: not worth a kernel launch.
        return _fastswish_jnp(x).astype(out_dtype)

    # 128-aligned prefix goes through the kernel; no full-tensor pad/slice.
    main = flat if n_main == n else flat[:n_main]
    rows = n_main // _LANES
    x2d = main.reshape(rows, _LANES)

    tile_rows = _pick_tile_rows(rows)
    grid = (pl.cdiv(rows, tile_rows),)

    in_bytes = n_main * x2d.dtype.itemsize
    out_bytes = n_main * jnp.dtype(out_dtype).itemsize

    out2d = pl.pallas_call(
        _fastswish_kernel,
        out_shape=jax.ShapeDtypeStruct((rows, _LANES), out_dtype),
        grid_spec=pltpu.PrefetchScalarGridSpec(
            num_scalar_prefetch=0,
            grid=grid,
            in_specs=[pl.BlockSpec((tile_rows, _LANES), lambda i: (i, 0))],
            out_specs=pl.BlockSpec((tile_rows, _LANES), lambda i: (i, 0)),
        ),
        compiler_params=pltpu.CompilerParams(
            # parallel grid lets both v7x TensorCores split the stream;
            # ~neutral on single-TC v5e/v6e.
            dimension_semantics=("parallel",),
            # Explicit scoped-VMEM budget with headroom under v7x's 64 MiB.
            vmem_limit_bytes=48 * 1024 * 1024,
        ),
        cost_estimate=pl.CostEstimate(
            flops=9 * n_main,
            transcendentals=n_main,   # one reciprocal per element
            bytes_accessed=in_bytes + out_bytes,
        ),
    )(x2d)

    out = out2d.reshape(-1)
    if n_main != n:
        # <128-element ragged tail: plain jnp (tiny), then append.
        tail = _fastswish_jnp(flat[n_main:]).astype(out_dtype)
        out = jnp.concatenate([out, tail])
    return out.reshape(orig_shape)


if __name__ == "__main__":
    key = jax.random.PRNGKey(0)
    # NCHW input, values spread so all three branches (x>3, x<-3, middle) hit.
    x = jax.random.normal(key, (2, 4, 16, 16), dtype=jnp.float32) * 4.0

    y = fastswish_custom_grad(x)
    jax.block_until_ready(y)
    y_ref = _fastswish_jnp(x)
    assert y.shape == x.shape and y.dtype == jnp.float32
    assert jnp.allclose(y, y_ref, atol=1e-5, rtol=1e-5)

    # fp16 path: cast is fused inside the kernel, output promoted to fp32.
    x16 = x.astype(jnp.float16)
    y16 = fastswish_custom_grad(x16)
    jax.block_until_ready(y16)
    assert y16.dtype == jnp.float32
    assert jnp.allclose(y16, _fastswish_jnp(x16), atol=1e-3, rtol=1e-3)

    # Ragged case exercising the aligned-prefix + jnp-tail path (1500 elems).
    x_rag = jax.random.normal(jax.random.PRNGKey(1), (5, 300), dtype=jnp.float32) * 4.0
    y_rag = fastswish_custom_grad(x_rag)
    jax.block_until_ready(y_rag)
    assert jnp.allclose(y_rag, _fastswish_jnp(x_rag), atol=1e-5, rtol=1e-5)

    # Tiny case (< 128 elements): pure-jnp fallback path.
    x_odd = jax.random.normal(jax.random.PRNGKey(2), (3, 5, 7), dtype=jnp.float32) * 4.0
    y_odd = fastswish_custom_grad(x_odd)
    jax.block_until_ready(y_odd)
    assert jnp.allclose(y_odd, _fastswish_jnp(x_odd), atol=1e-5, rtol=1e-5)

    print("KERNEL_OK")
</pallas_src>

<mosaic_0001>
module attributes {stable_mosaic.version = 11 : i64} {
  func.func @_fastswish_kernel(%arg0: i32, %arg1: memref<16x128xf32, #tpu.memory_space<vmem>>, %arg2: memref<16x128xf32, #tpu.memory_space<vmem>>) attributes {dimension_semantics = [#tpu.dimension_semantics<parallel>], iteration_bounds = array<i64: 1>, scalar_prefetch = 0 : i64, scratch_operands = 0 : i64, tpu.core_type = #tpu.core_type<tc>, window_params = [{transform_indices = @transform_0, window_bounds = array<i64: 16, 128>}, {transform_indices = @transform_1, window_bounds = array<i64: 16, 128>}]} {
    %c0 = arith.constant 0 : index
    %c0_0 = arith.constant 0 : index
    %0 = vector.load %arg1[%c0, %c0_0] : memref<16x128xf32, #tpu.memory_space<vmem>>, vector<16x128xf32>
    %cst = arith.constant 3.23076916 : f32
    %1 = vector.broadcast %cst : f32 to vector<16x128xf32>
    %2 = arith.addf %0, %1 : vector<16x128xf32>
    %3 = arith.mulf %0, %2 : vector<16x128xf32>
    %cst_1 = arith.constant 0.160493821 : f32
    %4 = vector.broadcast %cst_1 : f32 to vector<16x128xf32>
    %5 = arith.mulf %3, %4 : vector<16x128xf32>
    %cst_2 = arith.constant 3.000000e+00 : f32
    %6 = vector.broadcast %cst_2 : f32 to vector<16x128xf32>
    %7 = arith.cmpf ogt, %0, %6 : vector<16x128xf32>
    %8 = arith.select %7, %0, %5 : vector<16x128xi1>, vector<16x128xf32>
    %9 = arith.mulf %0, %0 : vector<16x128xf32>
    %10 = tpu.reciprocal %9 {approx = true} : vector<16x128xf32> -> vector<16x128xf32>
    %11 = arith.mulf %9, %10 : vector<16x128xf32>
    %cst_3 = arith.constant 2.000000e+00 : f32
    %12 = vector.broadcast %cst_3 : f32 to vector<16x128xf32>
    %13 = arith.subf %12, %11 : vector<16x128xf32>
    %14 = arith.mulf %10, %13 : vector<16x128xf32>
    %cst_4 = arith.constant -3.000000e+00 : f32
    %15 = vector.broadcast %cst_4 : f32 to vector<16x128xf32>
    %16 = arith.cmpf olt, %0, %15 : vector<16x128xf32>
    %cst_5 = arith.constant 0.000000e+00 : f32
    %17 = vector.broadcast %cst_5 : f32 to vector<16x128xf32>
    %18 = arith.subf %17, %14 : vector<16x128xf32>
    %19 = arith.select %16, %18, %8 : vector<16x128xi1>, vector<16x128xf32>
    %c0_6 = arith.constant 0 : index
    %c0_7 = arith.constant 0 : index
    %20 = vector.load %arg2[%c0_6, %c0_7] : memref<16x128xf32, #tpu.memory_space<vmem>>, vector<16x128xf32>
    tpu.vector_store %arg2[%c0_6, %c0_7], %19 {strides = array<i32>} : memref<16x128xf32, #tpu.memory_space<vmem>>, vector<16x128xf32>,
    return
  }
  func.func @transform_0(%arg0: i32) -> (i32, i32) {
    %c0_i32 = arith.constant 0 : i32
    %c0_i32_0 = arith.constant 0 : i32
    return %arg0, %c0_i32 : i32, i32
  }
  func.func @transform_1(%arg0: i32) -> (i32, i32) {
    %c0_i32 = arith.constant 0 : i32
    %c0_i32_0 = arith.constant 0 : i32
    return %arg0, %c0_i32 : i32, i32
  }
}

</mosaic_0001>

<bundles_post_ra>
// kernel: tpu_custom_call.1
= control target key start
LH: loop header
LB: loop body
LE: loop exit
PB: predicated region body
PF: predicated region fallthrough
CT: control target
= control target key end

     0   :  { %6 = vsyncpa [#allocation3], 0  ;;  %s148_s0 = inlined_call_operand.hbm [shape: f32[16,128], index: 0, kind: input, shape index: {}]   ;;  %s149_s1 = inlined_call_operand.hbm [shape: f32[16,128], index: 1, kind: output, shape index: {}]  }
   0x1   :  { %7 = vsyncpa [#allocation4], 0  ;;  %s122_s6 = smov [#allocation2]  }
   0x2   :  { %s13_s7 = sshll.u32 %s122_s6, 4  ;;  %s14_s7 = int_to_ptr.vmem [resolvable:$true] %s13_s7 }
   0x3   :  { %s86_s8 = scalar_lea.vmem %s14_s7, 256  ;;  %p91_p1 = scmp.lt.s32.totalorder %s14_s7, %s14_s7 }
   0x4   :  { %p87_p0 = scmp.ne.s32.totalorder %s14_s7, %s86_s8  ;;  %p92_p2 = scmp.lt.s32.totalorder %s86_s8, %s86_s8 }
   0x6   :  { %p93_p3 = por %p92_p2, %p91_p1 }
   0x8   :  { %p94_p4 = pnand %p93_p3, %p87_p0 }
   0xa   :  { %97 = shalt.err (!%p94_p4)
}
   0xb   :  { %s123_s9 = smov 128   ;;  %s124_s10 = smov 8  }
   0xc   :  { %19 = dma.hbm_to_vmem [thread:$0]  %s148_s0, 256, %s14_s7, [#allocation3], %s123_s9, %s123_s9, %s124_s10  }
   0xd   :  { %118 = dma.done.wait [#allocation3], 256  }
   0xe   :  { %119 = vsyncadd [#allocation3], 4294967040  ;;  %v23_v0 = vld [vmem:[#allocation2] sm:$0xff]  ;;  %v24_v1 = vld [vmem:[#allocation2 + $0x8] sm:$0xff]  ;;  %s125_s0 = smov [#allocation5]  }
   0xf   :  { %v35_v2 = vmul.f32 %v23_v0, %v23_v0  ;;  %v36_v3 = vmul.f32 %v24_v1, %v24_v1  ;;  %v25_v4 = vadd.f32 3.2307692, %v23_v0  ;;  %v26_v5 = vadd.f32 3.2307692, %v24_v1  ;;  %s58_s13 = sshll.u32 %s125_s0, 4  ;;  %s59_s13 = int_to_ptr.vmem [resolvable:$true] %s58_s13 }
  0x10   :  { %vm31_vm0 = vcmp.gt.f32.partialorder %v23_v0, 3.0  ;;  %vm32_vm1 = vcmp.gt.f32.partialorder %v24_v1, 3.0  ;;  %vm45_vm2 = vcmp.lt.f32.partialorder %v23_v0, -3.0  ;;  %vm46_vm3 = vcmp.lt.f32.partialorder %v24_v1, -3.0  ;;  %s98_s14 = scalar_lea.vmem %s59_s13, 256  ;;  %p103_p6 = scmp.lt.s32.totalorder %s59_s13, %s59_s13 }
  0x11   :  { %74 = vrcp.f32 %v35_v2  ;;  %v27_v6 = vmul.f32 %v25_v4, %v23_v0  ;;  %v28_v7 = vmul.f32 %v26_v5, %v24_v1  ;;  %p99_p5 = scmp.ne.s32.totalorder %s59_s13, %s98_s14  ;;  %p104_p7 = scmp.lt.s32.totalorder %s98_s14, %s98_s14 }
  0x12   :  { %76 = vrcp.f32 %v36_v3 }
  0x13   :  { %v29_v11 = vmul.f32 0.16049382, %v27_v6  ;;  %v30_v14 = vmul.f32 0.16049382, %v28_v7  ;;  %p105_p8 = por %p104_p7, %p103_p6 }
  0x15   :  { %v33_v17 = vsel %vm31_vm0, %v23_v0, %v29_v11  ;;  %v34_v20 = vsel %vm32_vm1, %v24_v1, %v30_v14  ;;  %p106_p9 = pnand %p105_p8, %p99_p5 }
  0x1e   :  { %v75_v8 = vpop.eup %74 }
  0x1f   :  { %v77_v9 = vpop.eup %76  ;;  %v39_v10 = vmul.f32 %v75_v8, %v35_v2 }
  0x20   :  { %v40_v12 = vmul.f32 %v77_v9, %v36_v3 }
  0x21   :  { %v41_v13 = vsub.f32 2.0, %v39_v10 }
  0x22   :  { %v42_v15 = vsub.f32 2.0, %v40_v12 }
  0x23   :  { %v43_v16 = vmul.f32 %v75_v8, %v41_v13 }
  0x24   :  { %v44_v18 = vmul.f32 %v77_v9, %v42_v15 }
  0x25   :  { %v47_v19 = vsub.f32 0.0, %v43_v16 }
  0x26   :  { %v48_v21 = vsub.f32 0.0, %v44_v18 }
  0x27   :  { %v49_v22 = vsel %vm45_vm2, %v47_v19, %v33_v17 }
  0x28   :  { %51 = vst [vmem:[#allocation5] sm:$0xff] %v49_v22  ;;  %v50_v23 = vsel %vm46_vm3, %v48_v21, %v34_v20 }
  0x29   :  { %52 = vst [vmem:[#allocation5 + $0x8] sm:$0xff] %v50_v23 }
  0x2a   :  { %109 = shalt.err (!%p106_p9)
}
  0x2b   :  { %64 = dma.vmem_to_hbm [thread:$0]  %s59_s13, 256, %s149_s1, [#allocation4], %s123_s9, %s123_s9, %s124_s10  }
  0x2c   :  { %120 = dma.done.wait [#allocation4], 256  }
  0x2d   :  { %121 = vsyncadd [#allocation4], 4294967040 }
  0x2e   :  { %68 = vsyncpa [#allocation3], 1 }
  0x2f   :  { %69 = vsyncpa [#allocation4], 1 }

</bundles_post_ra>
